<compile_context>
chip_gen: v6e
topology: v6e:2x2x1
jax: 0.10.0
libtpu: 0.0.40
codegen_flags: <defaults>
</compile_context>

<pallas_src>
import jax
import jax.numpy as jnp
import numpy as np
from jax.experimental import pallas as pl
from jax.experimental.pallas import tpu as pltpu


def _consistent_dropout_kernel(mask_ref, x_ref, o_ref):
    # mask_ref: (1, blk_f), pre-scaled to {0, 1/q}, same dtype as x.
    # Broadcast over the batch rows of the tile -> batch-consistent dropout,
    # all math in the native dtype (no f32 round-trip).
    o_ref[...] = x_ref[...] * mask_ref[...]


def _largest_divisor(n, limit, multiple_of=1):
    """Largest divisor of n that is <= limit and a multiple of `multiple_of`."""
    best = None
    d = 1
    while d * d <= n:
        if n % d == 0:
            for c in (d, n // d):
                if c <= limit and c % multiple_of == 0 and (best is None or c > best):
                    best = c
        d += 1
    return best


def _choose_tiles(B, F, itemsize, per_block_budget=4 * 1024 * 1024):
    """VMEM-budgeted tile sizes; prefer wide, lane-dense feature tiles."""
    if B * F * itemsize <= per_block_budget:
        return B, F  # everything fits in a single block
    # Feature tile: multiple of 128 lanes, sized so ~8 sublane rows fit budget.
    max_blk_f = max(128, per_block_budget // (8 * itemsize))
    blk_f = _largest_divisor(F, max_blk_f, multiple_of=128) or F
    # Batch tile: multiple of 8 sublanes when possible (unmasked vst).
    max_blk_b = max(1, per_block_budget // (blk_f * itemsize))
    blk_b = _largest_divisor(B, max_blk_b, multiple_of=8)
    if blk_b is None:
        # Small / awkward batch: keep the full extent (valid block shape; note
        # B < 8 sublane-starves the vregs and runs below roofline).
        blk_b = B
    return blk_b, blk_f


def consistent_dropout(x, seed=0, p=0.5, training=True):
    """Pallas implementation of ConsistentDropout.forward."""
    q = 1.0 - p
    if q == 1.0 or not training:
        return x

    orig_shape = x.shape
    B = orig_shape[0]
    F = int(np.prod(orig_shape[1:]))
    x2 = x.reshape(B, F)

    # Bernoulli(q) mask with shape [1] + x.shape[1:] (flattened), scaled by 1/q
    # -- exactly the torch module.  Generated once; broadcast over the batch
    # inside the kernel, so the mask is identical for every batch row and
    # independent of the tiling.
    key = jax.random.PRNGKey(seed)
    mask = (jax.random.bernoulli(key, q, (1, F)).astype(jnp.float32) / q).astype(x.dtype)

    # Pad the feature axis to a multiple of 128 lanes (lane-dense stores).
    F_pad = ((F + 127) // 128) * 128
    if F_pad != F:
        x2 = jnp.pad(x2, ((0, 0), (0, F_pad - F)))
        mask = jnp.pad(mask, ((0, 0), (0, F_pad - F)))

    itemsize = jnp.dtype(x.dtype).itemsize
    blk_b, blk_f = _choose_tiles(B, F_pad, itemsize)

    # Double-buffered x + out blocks plus the (1, blk_f) mask block.
    block_bytes = 2 * (2 * blk_b * blk_f + blk_f) * itemsize
    # >= 32 MiB (v5e default scoped VMEM is only 16 MiB), <= 48 MiB (v7x has
    # 64 MiB physical per TensorCore).
    vmem_limit = int(min(max(2 * block_bytes, 32 * 1024 * 1024), 48 * 1024 * 1024))

    out2 = pl.pallas_call(
        _consistent_dropout_kernel,
        out_shape=jax.ShapeDtypeStruct((B, F_pad), x.dtype),
        grid=(B // blk_b, F_pad // blk_f),
        in_specs=[
            pl.BlockSpec((1, blk_f), lambda b, j: (0, j)),      # mask: batch-invariant
            pl.BlockSpec((blk_b, blk_f), lambda b, j: (b, j)),  # x
        ],
        out_specs=pl.BlockSpec((blk_b, blk_f), lambda b, j: (b, j)),
        compiler_params=pltpu.CompilerParams(
            # Every tile is independent -> shard across v7x's two TensorCores.
            dimension_semantics=("parallel", "parallel"),
            vmem_limit_bytes=vmem_limit,
        ),
    )(mask, x2)

    if F_pad != F:
        out2 = out2[:, :F]
    return out2.reshape(orig_shape)


if __name__ == "__main__":
    key = jax.random.PRNGKey(0)
    # ConsistentDropout is shape-agnostic; use a small NCHW-like activation.
    x = jax.random.normal(key, (2, 4, 16, 16), dtype=jnp.float32)

    p = 0.5
    out = consistent_dropout(x, seed=123, p=p, training=True)
    out = jax.block_until_ready(out)

    out_np = np.asarray(out)
    x_np = np.asarray(x)

    # Mask must be identical across the batch dimension (consistency).
    zero_pattern0 = out_np[0] == 0.0
    zero_pattern1 = out_np[1] == 0.0
    assert np.array_equal(zero_pattern0, zero_pattern1), "mask not batch-consistent"

    # Kept entries are scaled by 1/q; roughly q of the entries are kept.
    q = 1.0 - p
    kept = ~zero_pattern0
    assert 0.25 < kept.mean() < 0.75, "keep rate far from q"
    assert np.allclose(out_np[0][kept], x_np[0][kept] / q, rtol=1e-6, atol=1e-6)
    assert np.allclose(out_np[1][kept], x_np[1][kept] / q, rtol=1e-6, atol=1e-6)

    # Eval mode / p == 0 is identity.
    ident = consistent_dropout(x, seed=123, p=p, training=False)
    assert np.array_equal(np.asarray(ident), x_np)
    ident2 = consistent_dropout(x, seed=123, p=0.0, training=True)
    assert np.array_equal(np.asarray(ident2), x_np)

    print("KERNEL_OK")
</pallas_src>

<mosaic_0001>
module attributes {stable_mosaic.version = 11 : i64} {
  func.func @_consistent_dropout_kernel(%arg0: i32, %arg1: i32, %arg2: memref<1x1024xf32, #tpu.memory_space<vmem>>, %arg3: memref<2x1024xf32, #tpu.memory_space<vmem>>, %arg4: memref<2x1024xf32, #tpu.memory_space<vmem>>) attributes {dimension_semantics = [#tpu.dimension_semantics<parallel>, #tpu.dimension_semantics<parallel>], iteration_bounds = array<i64: 1, 1>, scalar_prefetch = 0 : i64, scratch_operands = 0 : i64, tpu.core_type = #tpu.core_type<tc>, window_params = [{transform_indices = @transform_0, window_bounds = array<i64: 1, 1024>}, {transform_indices = @transform_1, window_bounds = array<i64: 2, 1024>}, {transform_indices = @transform_2, window_bounds = array<i64: 2, 1024>}]} {
    %c0 = arith.constant 0 : index
    %c0_0 = arith.constant 0 : index
    %0 = vector.load %arg3[%c0, %c0_0] : memref<2x1024xf32, #tpu.memory_space<vmem>>, vector<2x1024xf32>
    %c0_1 = arith.constant 0 : index
    %c0_2 = arith.constant 0 : index
    %1 = vector.load %arg2[%c0_1, %c0_2] : memref<1x1024xf32, #tpu.memory_space<vmem>>, vector<1x1024xf32>
    %2 = vector.broadcast %1 : vector<1x1024xf32> to vector<2x1024xf32>
    %3 = arith.mulf %0, %2 : vector<2x1024xf32>
    %c0_3 = arith.constant 0 : index
    %c0_4 = arith.constant 0 : index
    %4 = vector.load %arg4[%c0_3, %c0_4] : memref<2x1024xf32, #tpu.memory_space<vmem>>, vector<2x1024xf32>
    tpu.vector_store %arg4[%c0_3, %c0_4], %3 {strides = array<i32>} : memref<2x1024xf32, #tpu.memory_space<vmem>>, vector<2x1024xf32>,
    return
  }
  func.func @transform_0(%arg0: i32, %arg1: i32) -> (i32, i32) {
    %c0_i32 = arith.constant 0 : i32
    %c0_i32_0 = arith.constant 0 : i32
    return %c0_i32, %arg1 : i32, i32
  }
  func.func @transform_1(%arg0: i32, %arg1: i32) -> (i32, i32) {
    %c0_i32 = arith.constant 0 : i32
    return %arg0, %arg1 : i32, i32
  }
  func.func @transform_2(%arg0: i32, %arg1: i32) -> (i32, i32) {
    %c0_i32 = arith.constant 0 : i32
    return %arg0, %arg1 : i32, i32
  }
}

</mosaic_0001>

<bundles_post_ra>
// kernel: tpu_custom_call.1
= control target key start
LH: loop header
LB: loop body
LE: loop exit
PB: predicated region body
PF: predicated region fallthrough
CT: control target
= control target key end

     0   :  { %7 = vsyncpa [#allocation3], 0  ;;  %s226_s0 = inlined_call_operand.hbm [shape: f32[1,1024], index: 0, kind: input, shape index: {}]   ;;  %s227_s1 = inlined_call_operand.hbm [shape: f32[2,1024], index: 1, kind: input, shape index: {}]   ;;  %s228_s2 = inlined_call_operand.hbm [shape: f32[2,1024], index: 2, kind: output, shape index: {}]  }
   0x1   :  { %8 = vsyncpa [#allocation6], 0 }
   0x2   :  { %9 = vsyncpa [#allocation4], 0  ;;  %s198_s9 = smov [#allocation2]   ;;  %s199_s11 = smov [#allocation5]  }
   0x3   :  { %s16_s10 = sshll.u32 %s198_s9, 4  ;;  %s26_s12 = sshll.u32 %s199_s11, 4  ;;  %s17_s10 = int_to_ptr.vmem [resolvable:$true] %s16_s10  ;;  %s27_s12 = int_to_ptr.vmem [resolvable:$true] %s26_s12 }
   0x4   :  { %s140_s13 = scalar_lea.vmem %s17_s10, 128  ;;  %p145_p1 = scmp.lt.s32.totalorder %s17_s10, %s17_s10 }
   0x5   :  { %p141_p0 = scmp.ne.s32.totalorder %s17_s10, %s140_s13  ;;  %p146_p2 = scmp.lt.s32.totalorder %s140_s13, %s140_s13 }
   0x7   :  { %p147_p3 = por %p146_p2, %p145_p1 }
   0x9   :  { %p148_p4 = pnand %p147_p3, %p141_p0 }
   0xb   :  { %151 = shalt.err (!%p148_p4)
}
   0xc   :  { %19 = dma.hbm_to_vmem [thread:$0]  %s226_s0, 128, %s17_s10, [#allocation3]  }
   0xd   :  { %s160_s16 = scalar_lea.vmem %s27_s12, 256  ;;  %p165_p6 = scmp.lt.s32.totalorder %s27_s12, %s27_s12 }
   0xe   :  { %p161_p5 = scmp.ne.s32.totalorder %s27_s12, %s160_s16  ;;  %p166_p7 = scmp.lt.s32.totalorder %s160_s16, %s160_s16 }
  0x10   :  { %p167_p8 = por %p166_p7, %p165_p6 }
  0x12   :  { %p168_p9 = pnand %p167_p8, %p161_p5 }
  0x14   :  { %171 = shalt.err (!%p168_p9)
}
  0x15   :  { %29 = dma.hbm_to_vmem [thread:$0]  %s227_s1, 256, %s27_s12, [#allocation6]  }
  0x16   :  { %192 = dma.done.wait [#allocation3], 128  }
  0x17   :  { %193 = vsyncadd [#allocation3], 4294967168 }
  0x18   :  { %194 = dma.done.wait [#allocation6], 256  }
  0x19   :  { %195 = vsyncadd [#allocation6], 4294967040  ;;  %v40_v0 = vlaneseq  ;;  %v200_v1 = vmov 1983009808   ;;  %v38_v13 = vld [vmem:[#allocation2] sm:$0xff]  ;;  %v36_v29 = vld [vmem:[#allocation5] sm:$0xff] }
  0x1a   :  { %v75_v2 = vunpack.c.l.s4 %v200_v1  ;;  %v37_v33 = vld [vmem:[#allocation5 + $0x8] sm:$0xff]  ;;  %s201_s0 = smov [#allocation7]  }
  0x1b   :  { %v41_v3 = vshrl.u32 %v40_v0, 7  ;;  %s118_s1 = sshll.u32 %s201_s0, 4  ;;  %s119_s1 = int_to_ptr.vmem [resolvable:$true] %s118_s1 }
  0x1c   :  { %v76_v4 = vunpack.c.0.s8 %v75_v2  ;;  %s172_s19 = scalar_lea.vmem %s119_s1, 256  ;;  %p177_p11 = scmp.lt.s32.totalorder %s119_s1, %s119_s1 }
  0x1d   :  { %v42_v5 = vsub.s32 0, %v41_v3  ;;  %v46_v6 = vsub.s32 1, %v41_v3  ;;  %v50_v7 = vsub.s32 2, %v41_v3  ;;  %v54_v8 = vsub.s32 3, %v41_v3  ;;  %p173_p10 = scmp.ne.s32.totalorder %s119_s1, %s172_s19  ;;  %p178_p12 = scmp.lt.s32.totalorder %s172_s19, %s172_s19 }
  0x1e   :  { %v58_v9 = vsub.s32 4, %v41_v3  ;;  %v62_v10 = vsub.s32 5, %v41_v3  ;;  %v66_v11 = vsub.s32 6, %v41_v3  ;;  %v70_v12 = vsub.s32 7, %v41_v3 }
  0x1f   :  { %v79_v14 = vsub.s32 %v76_v4, %v41_v3  ;;  %v43_v15 = vrot.slane %v38_v13, %v42_v5  ;;  %v47_v16 = vrot.slane %v38_v13, %v46_v6  ;;  %v51_v17 = vrot.slane %v38_v13, %v50_v7  ;;  %p179_p13 = por %p178_p12, %p177_p11 }
  0x20   :  { %v55_v18 = vrot.slane %v38_v13, %v54_v8  ;;  %v59_v19 = vrot.slane %v38_v13, %v58_v9  ;;  %v63_v20 = vrot.slane %v38_v13, %v62_v10  ;;  %v67_v21 = vrot.slane %v38_v13, %v66_v11 }
  0x21   :  { %v71_v22 = vrot.slane %v38_v13, %v70_v12  ;;  %v72_v23 = vcombine.low %v43_v15, %v47_v16  ;;  %p180_p0 = pnand %p179_p13, %p173_p10 }
  0x22   :  { %v73_v24 = vcombine.low %v51_v17, %v55_v18  ;;  %v89_v25 = vcombine.low %v59_v19, %v63_v20 }
  0x23   :  { %v90_v26 = vcombine.low %v67_v21, %v71_v22  ;;  %v80_v27 = vrot.slane %v72_v23, %v79_v14 }
  0x24   :  { %v87_v28 = vrot.slane %v73_v24, %v79_v14  ;;  %v97_v30 = vrot.slane %v89_v25, %v79_v14 }
  0x25   :  { %v104_v31 = vrot.slane %v90_v26, %v79_v14 }
  0x26   :  { %v88_v32 = vcombine.low %v80_v27, %v87_v28 }
  0x27   :  { %v105_v34 = vcombine.low %v97_v30, %v104_v31 }
  0x28   :  { %v108_v35 = vmul.f32 %v88_v32, %v36_v29 }
  0x29   :  { %v109_v36 = vmul.f32 %v105_v34, %v37_v33 }
  0x2a   :  { %110 = vst [vmem:[#allocation7] sm:$0xff] %v108_v35 }
  0x2b   :  { %111 = vst [vmem:[#allocation7 + $0x8] sm:$0xff] %v109_v36 }
  0x2c   :  { %183 = shalt.err (!%p180_p0)
}
  0x2d   :  { %121 = dma.vmem_to_hbm [thread:$0]  %s119_s1, 256, %s228_s2, [#allocation4]  }
  0x2e   :  { %196 = dma.done.wait [#allocation4], 256  }
  0x2f   :  { %197 = vsyncadd [#allocation4], 4294967040 }
  0x30   :  { %125 = vsyncpa [#allocation3], 1 }
  0x31   :  { %126 = vsyncpa [#allocation6], 1 }
  0x32   :  { %127 = vsyncpa [#allocation4], 1 }

</bundles_post_ra>
